<compile_context>
chip_gen: v6e
topology: v6e:2x2x1
jax: 0.10.0
libtpu: 0.0.40
codegen_flags: <defaults>
</compile_context>

<pallas_src>
import functools
import math

import jax
import jax.numpy as jnp
from jax.experimental import pallas as pl
from jax.experimental.pallas import tpu as pltpu


def _round_up(x: int, m: int) -> int:
    return ((x + m - 1) // m) * m


def _rel_geom_kernel(g0_ref, g1_ref, c_ref, w_ref, o_ref, feat_ref, *,
                     inv_sigma: float, n_basis: int, base: int):
    # g0/g1: (12, tile) feature-major = [t (3 rows) | R row-major (9 rows)].
    g0 = g0_ref[...]
    g1 = g1_ref[...]

    # Zero the feature scratch every step (covers the alignment-padding rows; cheap).
    feat_ref[...] = jnp.zeros_like(feat_ref)

    dt = g1[0:3, :] - g0[0:3, :]                        # (3, tile) = t_j - t_i
    dx, dy, dz = dt[0:1, :], dt[1:2, :], dt[2:3, :]     # (1, tile) each
    d2 = dx * dx + dy * dy + dz * dz                    # (1, tile)
    dist = jnp.sqrt(d2)
    inv_norm = jax.lax.rsqrt(d2 + 1.0)                  # 1 / sqrt(d^2 + 1)

    # RBF features (centers arrive pre-scaled by 1/sigma).  (n_basis, tile)
    diff = dist * inv_sigma - c_ref[...]
    feat_ref[0:n_basis, :] = jnp.exp(-(diff * diff))

    ri = g0[3:12, :]                                    # (9, tile) rows of R_i (row-major)
    rj = g1[3:12, :]

    # dir_l = (dt^T R_i) / sqrt(d^2+1) ; dir_r = ((-dt)^T R_j) / sqrt(d^2+1)   (3, tile)
    dir_l = (dx * ri[0:3, :] + dy * ri[3:6, :] + dz * ri[6:9, :]) * inv_norm
    dir_r = (dx * rj[0:3, :] + dy * rj[3:6, :] + dz * rj[6:9, :]) * (-inv_norm)
    feat_ref[base:base + 3, :] = dir_l
    feat_ref[base + 8:base + 11, :] = dir_r

    # O = R_i^T R_j ; flattened row a (length 3) = sum_m R_i[m, a] * R_j[m, :].
    for a in range(3):
        o_a = (ri[a:a + 1, :] * rj[0:3, :]
               + ri[3 + a:4 + a, :] * rj[3:6, :]
               + ri[6 + a:7 + a, :] * rj[6:9, :])        # (3, tile)
        off = base + 16 + 8 * a
        feat_ref[off:off + 3, :] = o_a

    # Single MXU matmul; output tile is lane-dense (tile, out_dim).
    o_ref[...] = jnp.dot(feat_ref[...].T, w_ref[...],
                         preferred_element_type=jnp.float32).astype(o_ref.dtype)


def relative_geometry_encoding(frame_t, frame_R, merged_edge_idx, rbf_centers,
                               proj_weight, sigma: float = 1.0,
                               tile_edges: int = 2048,
                               out_dtype=jnp.float32):
    """Pallas equivalent of RelativeGeometryEncoding.forward.

    frame_t: (N, 3), frame_R: (N, 3, 3), merged_edge_idx: (idx0, idx1) each (E,),
    rbf_centers: (n_basis,), proj_weight: (out_dim, n_basis + 15)  [nn.Linear, no bias].
    Returns (E, out_dim).
    """
    idx0, idx1 = merged_edge_idx
    E = int(idx0.shape[0])
    n_basis = int(rbf_centers.shape[0])
    out_dim, feat_dim = proj_weight.shape
    assert feat_dim == n_basis + 15

    f32 = jnp.float32
    n_frames = frame_t.shape[0]
    packed = jnp.concatenate(
        [frame_t.astype(f32), frame_R.astype(f32).reshape(n_frames, 9)], axis=-1)  # (N, 12)

    # Wrapper-side gather (XLA): one contiguous 48 B row per edge endpoint.
    g0 = jnp.take(packed, idx0, axis=0)            # (E, 12)
    g1 = jnp.take(packed, idx1, axis=0)            # (E, 12)

    # Edge tile: multiple of 128 (it is the lane dim of the feature-major input blocks).
    tile = max(128, min(_round_up(int(tile_edges), 128), _round_up(E, 128)))
    E_pad = _round_up(E, tile)
    pad = E_pad - E
    if pad:
        g0 = jnp.pad(g0, ((0, pad), (0, 0)))
        g1 = jnp.pad(g1, ((0, pad), (0, 0)))
    g0 = g0.T                                      # (12, E_pad) feature-major
    g1 = g1.T

    # Feature layout inside feat^T scratch (all group offsets 8-aligned):
    #   [0, n_basis)         : rbf
    #   [base +  0, base+ 3) : dir_l        base = round_up(n_basis, 8)
    #   [base +  8, base+11) : dir_r
    #   [base + 16, base+19) : orient row 0
    #   [base + 24, base+27) : orient row 1
    #   [base + 32, base+35) : orient row 2
    base = _round_up(n_basis, 8)
    K_pad = base + 40

    wt = proj_weight.astype(f32).T                 # (n_basis + 15, out_dim)
    w_pad = jnp.zeros((K_pad, out_dim), f32)
    w_pad = w_pad.at[0:n_basis].set(wt[0:n_basis])
    w_pad = w_pad.at[base:base + 3].set(wt[n_basis:n_basis + 3])
    w_pad = w_pad.at[base + 8:base + 11].set(wt[n_basis + 3:n_basis + 6])
    for a in range(3):
        w_pad = w_pad.at[base + 16 + 8 * a:base + 19 + 8 * a].set(
            wt[n_basis + 6 + 3 * a:n_basis + 9 + 3 * a])

    c_scaled = (rbf_centers.astype(f32) / float(sigma)).reshape(n_basis, 1)

    kernel = functools.partial(_rel_geom_kernel, inv_sigma=1.0 / float(sigma),
                               n_basis=n_basis, base=base)

    out = pl.pallas_call(
        kernel,
        out_shape=jax.ShapeDtypeStruct((E_pad, out_dim), out_dtype),
        grid_spec=pltpu.PrefetchScalarGridSpec(
            num_scalar_prefetch=0,
            grid=(E_pad // tile,),
            in_specs=[
                pl.BlockSpec((12, tile), lambda i: (0, i)),
                pl.BlockSpec((12, tile), lambda i: (0, i)),
                pl.BlockSpec((n_basis, 1), lambda i: (0, 0)),
                pl.BlockSpec((K_pad, out_dim), lambda i: (0, 0)),
            ],
            out_specs=pl.BlockSpec((tile, out_dim), lambda i: (i, 0)),
            scratch_shapes=[pltpu.VMEM((K_pad, tile), jnp.float32)],
        ),
        compiler_params=pltpu.CompilerParams(
            dimension_semantics=("parallel",)),
    )(g0, g1, c_scaled, w_pad)

    if pad:
        out = out[:E]
    return out


def relative_geometry_encoding_ref(frame_t, frame_R, merged_edge_idx, rbf_centers,
                                   proj_weight, sigma: float = 1.0):
    """Pure-JAX reference mirroring the PyTorch forward exactly."""
    idx0, idx1 = merged_edge_idx
    ti, tj = frame_t[idx0], frame_t[idx1]
    Ri, Rj = frame_R[idx0], frame_R[idx1]
    d = jnp.sqrt(jnp.sum((ti - tj) ** 2, axis=-1))                       # (E,)
    denom = jnp.sqrt(d * d + 1.0)[:, None]
    dir_l = jnp.sum((tj - ti)[:, :, None] * Ri, axis=1) / denom          # (E, 3)
    dir_r = jnp.sum((ti - tj)[:, :, None] * Rj, axis=1) / denom          # (E, 3)
    orient = jnp.sum(Ri[:, :, :, None] * Rj[:, :, None, :], axis=1)      # (E, 3, 3) = Ri^T Rj
    orient = orient.reshape(orient.shape[0], 9)
    diff = (d[:, None] - rbf_centers[None, :]) / sigma
    rbf = jnp.exp(-(diff * diff))
    feat = jnp.concatenate([rbf, dir_l, dir_r, orient], axis=-1)
    return jnp.dot(feat, proj_weight.T, precision=jax.lax.Precision.HIGHEST)


def _quat_to_rotmat(q):
    q = q / jnp.linalg.norm(q, axis=-1, keepdims=True)
    w, x, y, z = q[:, 0], q[:, 1], q[:, 2], q[:, 3]
    R = jnp.stack([
        1 - 2 * (y * y + z * z), 2 * (x * y - w * z), 2 * (x * z + w * y),
        2 * (x * y + w * z), 1 - 2 * (x * x + z * z), 2 * (y * z - w * x),
        2 * (x * z - w * y), 2 * (y * z + w * x), 1 - 2 * (x * x + y * y),
    ], axis=-1)
    return R.reshape(-1, 3, 3)


if __name__ == "__main__":
    key = jax.random.PRNGKey(0)
    k1, k2, k3, k4, k5 = jax.random.split(key, 5)

    # Module config (small, deterministic).
    n_frames = 48
    n_edges = 200
    n_basis = 16
    out_dim = 128          # lane-dense output (multiple of 128)
    d_max = 20.0
    sigma = 1.0            # GaussianRBFEncoding1D default inside RelativeGeometryEncoding

    frame_t = jax.random.uniform(k1, (n_frames, 3), dtype=jnp.float32,
                                 minval=-8.0, maxval=8.0)
    frame_R = _quat_to_rotmat(jax.random.normal(k2, (n_frames, 4), dtype=jnp.float32))
    idx0 = jax.random.randint(k3, (n_edges,), 0, n_frames)
    idx1 = jax.random.randint(k4, (n_edges,), 0, n_frames)

    rbf_centers = jnp.linspace(0.0, d_max, n_basis, dtype=jnp.float32)
    proj_weight = (jax.random.normal(k5, (out_dim, n_basis + 15), dtype=jnp.float32)
                   / math.sqrt(n_basis + 15))

    ref = relative_geometry_encoding_ref(frame_t, frame_R, (idx0, idx1),
                                         rbf_centers, proj_weight, sigma=sigma)

    # Default (large-tile) configuration: single grid step at this small size.
    out = relative_geometry_encoding(frame_t, frame_R, (idx0, idx1),
                                     rbf_centers, proj_weight, sigma=sigma)
    out = jax.block_until_ready(out)
    assert out.shape == (n_edges, out_dim), out.shape
    err = float(jnp.max(jnp.abs(out - ref)))
    assert jnp.allclose(out, ref, atol=2e-3, rtol=2e-3), err

    # Smaller tile to exercise the multi-step grid / padding path.
    out2 = relative_geometry_encoding(frame_t, frame_R, (idx0, idx1),
                                      rbf_centers, proj_weight, sigma=sigma,
                                      tile_edges=128)
    out2 = jax.block_until_ready(out2)
    err2 = float(jnp.max(jnp.abs(out2 - ref)))
    assert jnp.allclose(out2, ref, atol=2e-3, rtol=2e-3), err2

    print("KERNEL_OK")
</pallas_src>

<mosaic_0001>
module attributes {stable_mosaic.version = 11 : i64} {
  func.func @_rel_geom_kernel(%arg0: i32, %arg1: memref<12x256xf32, #tpu.memory_space<vmem>>, %arg2: memref<12x256xf32, #tpu.memory_space<vmem>>, %arg3: memref<16x1xf32, #tpu.memory_space<vmem>>, %arg4: memref<56x128xf32, #tpu.memory_space<vmem>>, %arg5: memref<256x128xf32, #tpu.memory_space<vmem>>, %arg6: memref<56x256xf32, #tpu.memory_space<vmem>>) attributes {dimension_semantics = [#tpu.dimension_semantics<parallel>], iteration_bounds = array<i64: 1>, scalar_prefetch = 0 : i64, scratch_operands = 1 : i64, tpu.core_type = #tpu.core_type<tc>, window_params = [{transform_indices = @transform_0, window_bounds = array<i64: 12, 256>}, {transform_indices = @transform_1, window_bounds = array<i64: 12, 256>}, {pipeline_mode = #tpu.pipeline_mode<synchronous>, transform_indices = @transform_2, window_bounds = array<i64: 16, 1>}, {pipeline_mode = #tpu.pipeline_mode<synchronous>, transform_indices = @transform_3, window_bounds = array<i64: 56, 128>}, {transform_indices = @transform_4, window_bounds = array<i64: 256, 128>}]} {
    %c0 = arith.constant 0 : index
    %c0_0 = arith.constant 0 : index
    %0 = vector.load %arg1[%c0, %c0_0] : memref<12x256xf32, #tpu.memory_space<vmem>>, vector<12x256xf32>
    %c0_1 = arith.constant 0 : index
    %c0_2 = arith.constant 0 : index
    %1 = vector.load %arg2[%c0_1, %c0_2] : memref<12x256xf32, #tpu.memory_space<vmem>>, vector<12x256xf32>
    %cst = arith.constant 0.000000e+00 : f32
    %2 = vector.broadcast %cst : f32 to vector<56x256xf32>
    %c0_3 = arith.constant 0 : index
    %c0_4 = arith.constant 0 : index
    %3 = vector.load %arg6[%c0_3, %c0_4] : memref<56x256xf32, #tpu.memory_space<vmem>>, vector<56x256xf32>
    tpu.vector_store %arg6[%c0_3, %c0_4], %2 {strides = array<i32>} : memref<56x256xf32, #tpu.memory_space<vmem>>, vector<56x256xf32>,
    %4 = vector.extract_strided_slice %1 {offsets = [0, 0], sizes = [3, 256], strides = [1, 1]} : vector<12x256xf32> to vector<3x256xf32>
    %5 = vector.extract_strided_slice %0 {offsets = [0, 0], sizes = [3, 256], strides = [1, 1]} : vector<12x256xf32> to vector<3x256xf32>
    %6 = arith.subf %4, %5 : vector<3x256xf32>
    %7 = vector.extract_strided_slice %6 {offsets = [0, 0], sizes = [1, 256], strides = [1, 1]} : vector<3x256xf32> to vector<1x256xf32>
    %8 = vector.extract_strided_slice %6 {offsets = [1, 0], sizes = [1, 256], strides = [1, 1]} : vector<3x256xf32> to vector<1x256xf32>
    %9 = vector.extract_strided_slice %6 {offsets = [2, 0], sizes = [1, 256], strides = [1, 1]} : vector<3x256xf32> to vector<1x256xf32>
    %10 = arith.mulf %7, %7 : vector<1x256xf32>
    %11 = arith.mulf %8, %8 : vector<1x256xf32>
    %12 = arith.addf %10, %11 : vector<1x256xf32>
    %13 = arith.mulf %9, %9 : vector<1x256xf32>
    %14 = arith.addf %12, %13 : vector<1x256xf32>
    %15 = math.sqrt %14 : vector<1x256xf32>
    %cst_5 = arith.constant 1.000000e+00 : f32
    %16 = vector.broadcast %cst_5 : f32 to vector<1x256xf32>
    %17 = arith.addf %14, %16 : vector<1x256xf32>
    %18 = math.rsqrt %17 : vector<1x256xf32>
    %cst_6 = arith.constant 1.000000e+00 : f32
    %19 = vector.broadcast %cst_6 : f32 to vector<1x256xf32>
    %20 = arith.mulf %15, %19 : vector<1x256xf32>
    %c0_7 = arith.constant 0 : index
    %c0_8 = arith.constant 0 : index
    %21 = vector.load %arg3[%c0_7, %c0_8] : memref<16x1xf32, #tpu.memory_space<vmem>>, vector<16x1xf32>
    %22 = vector.broadcast %20 : vector<1x256xf32> to vector<16x256xf32>
    %23 = vector.broadcast %21 : vector<16x1xf32> to vector<16x256xf32>
    %24 = arith.subf %22, %23 : vector<16x256xf32>
    %25 = arith.mulf %24, %24 : vector<16x256xf32>
    %cst_9 = arith.constant 0.000000e+00 : f32
    %26 = vector.broadcast %cst_9 : f32 to vector<16x256xf32>
    %27 = arith.subf %26, %25 : vector<16x256xf32>
    %28 = math.exp %27 : vector<16x256xf32>
    %c0_10 = arith.constant 0 : index
    %c0_11 = arith.constant 0 : index
    %29 = vector.load %arg6[%c0_10, %c0_11] : memref<56x256xf32, #tpu.memory_space<vmem>>, vector<16x256xf32>
    tpu.vector_store %arg6[%c0_10, %c0_11], %28 {strides = array<i32>} : memref<56x256xf32, #tpu.memory_space<vmem>>, vector<16x256xf32>,
    %30 = vector.extract_strided_slice %0 {offsets = [3, 0], sizes = [9, 256], strides = [1, 1]} : vector<12x256xf32> to vector<9x256xf32>
    %31 = vector.extract_strided_slice %1 {offsets = [3, 0], sizes = [9, 256], strides = [1, 1]} : vector<12x256xf32> to vector<9x256xf32>
    %32 = vector.extract_strided_slice %30 {offsets = [0, 0], sizes = [3, 256], strides = [1, 1]} : vector<9x256xf32> to vector<3x256xf32>
    %33 = vector.broadcast %7 : vector<1x256xf32> to vector<3x256xf32>
    %34 = arith.mulf %33, %32 : vector<3x256xf32>
    %35 = vector.extract_strided_slice %30 {offsets = [3, 0], sizes = [3, 256], strides = [1, 1]} : vector<9x256xf32> to vector<3x256xf32>
    %36 = vector.broadcast %8 : vector<1x256xf32> to vector<3x256xf32>
    %37 = arith.mulf %36, %35 : vector<3x256xf32>
    %38 = arith.addf %34, %37 : vector<3x256xf32>
    %39 = vector.extract_strided_slice %30 {offsets = [6, 0], sizes = [3, 256], strides = [1, 1]} : vector<9x256xf32> to vector<3x256xf32>
    %40 = vector.broadcast %9 : vector<1x256xf32> to vector<3x256xf32>
    %41 = arith.mulf %40, %39 : vector<3x256xf32>
    %42 = arith.addf %38, %41 : vector<3x256xf32>
    %43 = vector.broadcast %18 : vector<1x256xf32> to vector<3x256xf32>
    %44 = arith.mulf %42, %43 : vector<3x256xf32>
    %45 = vector.extract_strided_slice %31 {offsets = [0, 0], sizes = [3, 256], strides = [1, 1]} : vector<9x256xf32> to vector<3x256xf32>
    %46 = vector.broadcast %7 : vector<1x256xf32> to vector<3x256xf32>
    %47 = arith.mulf %46, %45 : vector<3x256xf32>
    %48 = vector.extract_strided_slice %31 {offsets = [3, 0], sizes = [3, 256], strides = [1, 1]} : vector<9x256xf32> to vector<3x256xf32>
    %49 = vector.broadcast %8 : vector<1x256xf32> to vector<3x256xf32>
    %50 = arith.mulf %49, %48 : vector<3x256xf32>
    %51 = arith.addf %47, %50 : vector<3x256xf32>
    %52 = vector.extract_strided_slice %31 {offsets = [6, 0], sizes = [3, 256], strides = [1, 1]} : vector<9x256xf32> to vector<3x256xf32>
    %53 = vector.broadcast %9 : vector<1x256xf32> to vector<3x256xf32>
    %54 = arith.mulf %53, %52 : vector<3x256xf32>
    %55 = arith.addf %51, %54 : vector<3x256xf32>
    %cst_12 = arith.constant 0.000000e+00 : f32
    %56 = vector.broadcast %cst_12 : f32 to vector<1x256xf32>
    %57 = arith.subf %56, %18 : vector<1x256xf32>
    %58 = vector.broadcast %57 : vector<1x256xf32> to vector<3x256xf32>
    %59 = arith.mulf %55, %58 : vector<3x256xf32>
    %c16 = arith.constant 16 : index
    %c0_13 = arith.constant 0 : index
    %60 = vector.load %arg6[%c16, %c0_13] : memref<56x256xf32, #tpu.memory_space<vmem>>, vector<3x256xf32>
    tpu.vector_store %arg6[%c16, %c0_13], %44 {strides = array<i32>} : memref<56x256xf32, #tpu.memory_space<vmem>>, vector<3x256xf32>,
    %c24 = arith.constant 24 : index
    %c0_14 = arith.constant 0 : index
    %61 = vector.load %arg6[%c24, %c0_14] : memref<56x256xf32, #tpu.memory_space<vmem>>, vector<3x256xf32>
    tpu.vector_store %arg6[%c24, %c0_14], %59 {strides = array<i32>} : memref<56x256xf32, #tpu.memory_space<vmem>>, vector<3x256xf32>,
    %62 = vector.extract_strided_slice %30 {offsets = [0, 0], sizes = [1, 256], strides = [1, 1]} : vector<9x256xf32> to vector<1x256xf32>
    %63 = vector.extract_strided_slice %31 {offsets = [0, 0], sizes = [3, 256], strides = [1, 1]} : vector<9x256xf32> to vector<3x256xf32>
    %64 = vector.broadcast %62 : vector<1x256xf32> to vector<3x256xf32>
    %65 = arith.mulf %64, %63 : vector<3x256xf32>
    %66 = vector.extract_strided_slice %30 {offsets = [3, 0], sizes = [1, 256], strides = [1, 1]} : vector<9x256xf32> to vector<1x256xf32>
    %67 = vector.extract_strided_slice %31 {offsets = [3, 0], sizes = [3, 256], strides = [1, 1]} : vector<9x256xf32> to vector<3x256xf32>
    %68 = vector.broadcast %66 : vector<1x256xf32> to vector<3x256xf32>
    %69 = arith.mulf %68, %67 : vector<3x256xf32>
    %70 = arith.addf %65, %69 : vector<3x256xf32>
    %71 = vector.extract_strided_slice %30 {offsets = [6, 0], sizes = [1, 256], strides = [1, 1]} : vector<9x256xf32> to vector<1x256xf32>
    %72 = vector.extract_strided_slice %31 {offsets = [6, 0], sizes = [3, 256], strides = [1, 1]} : vector<9x256xf32> to vector<3x256xf32>
    %73 = vector.broadcast %71 : vector<1x256xf32> to vector<3x256xf32>
    %74 = arith.mulf %73, %72 : vector<3x256xf32>
    %75 = arith.addf %70, %74 : vector<3x256xf32>
    %c32 = arith.constant 32 : index
    %c0_15 = arith.constant 0 : index
    %76 = vector.load %arg6[%c32, %c0_15] : memref<56x256xf32, #tpu.memory_space<vmem>>, vector<3x256xf32>
    tpu.vector_store %arg6[%c32, %c0_15], %75 {strides = array<i32>} : memref<56x256xf32, #tpu.memory_space<vmem>>, vector<3x256xf32>,
    %77 = vector.extract_strided_slice %30 {offsets = [1, 0], sizes = [1, 256], strides = [1, 1]} : vector<9x256xf32> to vector<1x256xf32>
    %78 = vector.extract_strided_slice %31 {offsets = [0, 0], sizes = [3, 256], strides = [1, 1]} : vector<9x256xf32> to vector<3x256xf32>
    %79 = vector.broadcast %77 : vector<1x256xf32> to vector<3x256xf32>
    %80 = arith.mulf %79, %78 : vector<3x256xf32>
    %81 = vector.extract_strided_slice %30 {offsets = [4, 0], sizes = [1, 256], strides = [1, 1]} : vector<9x256xf32> to vector<1x256xf32>
    %82 = vector.extract_strided_slice %31 {offsets = [3, 0], sizes = [3, 256], strides = [1, 1]} : vector<9x256xf32> to vector<3x256xf32>
    %83 = vector.broadcast %81 : vector<1x256xf32> to vector<3x256xf32>
    %84 = arith.mulf %83, %82 : vector<3x256xf32>
    %85 = arith.addf %80, %84 : vector<3x256xf32>
    %86 = vector.extract_strided_slice %30 {offsets = [7, 0], sizes = [1, 256], strides = [1, 1]} : vector<9x256xf32> to vector<1x256xf32>
    %87 = vector.extract_strided_slice %31 {offsets = [6, 0], sizes = [3, 256], strides = [1, 1]} : vector<9x256xf32> to vector<3x256xf32>
    %88 = vector.broadcast %86 : vector<1x256xf32> to vector<3x256xf32>
    %89 = arith.mulf %88, %87 : vector<3x256xf32>
    %90 = arith.addf %85, %89 : vector<3x256xf32>
    %c40 = arith.constant 40 : index
    %c0_16 = arith.constant 0 : index
    %91 = vector.load %arg6[%c40, %c0_16] : memref<56x256xf32, #tpu.memory_space<vmem>>, vector<3x256xf32>
    tpu.vector_store %arg6[%c40, %c0_16], %90 {strides = array<i32>} : memref<56x256xf32, #tpu.memory_space<vmem>>, vector<3x256xf32>,
    %92 = vector.extract_strided_slice %30 {offsets = [2, 0], sizes = [1, 256], strides = [1, 1]} : vector<9x256xf32> to vector<1x256xf32>
    %93 = vector.extract_strided_slice %31 {offsets = [0, 0], sizes = [3, 256], strides = [1, 1]} : vector<9x256xf32> to vector<3x256xf32>
    %94 = vector.broadcast %92 : vector<1x256xf32> to vector<3x256xf32>
    %95 = arith.mulf %94, %93 : vector<3x256xf32>
    %96 = vector.extract_strided_slice %30 {offsets = [5, 0], sizes = [1, 256], strides = [1, 1]} : vector<9x256xf32> to vector<1x256xf32>
    %97 = vector.extract_strided_slice %31 {offsets = [3, 0], sizes = [3, 256], strides = [1, 1]} : vector<9x256xf32> to vector<3x256xf32>
    %98 = vector.broadcast %96 : vector<1x256xf32> to vector<3x256xf32>
    %99 = arith.mulf %98, %97 : vector<3x256xf32>
    %100 = arith.addf %95, %99 : vector<3x256xf32>
    %101 = vector.extract_strided_slice %30 {offsets = [8, 0], sizes = [1, 256], strides = [1, 1]} : vector<9x256xf32> to vector<1x256xf32>
    %102 = vector.extract_strided_slice %31 {offsets = [6, 0], sizes = [3, 256], strides = [1, 1]} : vector<9x256xf32> to vector<3x256xf32>
    %103 = vector.broadcast %101 : vector<1x256xf32> to vector<3x256xf32>
    %104 = arith.mulf %103, %102 : vector<3x256xf32>
    %105 = arith.addf %100, %104 : vector<3x256xf32>
    %c48 = arith.constant 48 : index
    %c0_17 = arith.constant 0 : index
    %106 = vector.load %arg6[%c48, %c0_17] : memref<56x256xf32, #tpu.memory_space<vmem>>, vector<3x256xf32>
    tpu.vector_store %arg6[%c48, %c0_17], %105 {strides = array<i32>} : memref<56x256xf32, #tpu.memory_space<vmem>>, vector<3x256xf32>,
    %c0_18 = arith.constant 0 : index
    %c0_19 = arith.constant 0 : index
    %107 = vector.load %arg6[%c0_18, %c0_19] : memref<56x256xf32, #tpu.memory_space<vmem>>, vector<56x256xf32>
    %108 = tpu.transpose %107, [1, 0] : vector<56x256xf32> -> vector<256x56xf32>
    %c0_20 = arith.constant 0 : index
    %c0_21 = arith.constant 0 : index
    %109 = vector.load %arg4[%c0_20, %c0_21] : memref<56x128xf32, #tpu.memory_space<vmem>>, vector<56x128xf32>
    %cst_22 = arith.constant dense<0.000000e+00> : vector<256x128xf32>
    %110 = tpu.matmul %108, %109, %cst_22 {dimension_numbers = #tpu.dot_dimension_numbers<[1], [0], [0], [1], [0, 0, 1, 1], [], []>} : vector<256x56xf32>, vector<56x128xf32>, vector<256x128xf32> -> vector<256x128xf32>
    %c0_23 = arith.constant 0 : index
    %c0_24 = arith.constant 0 : index
    %111 = vector.load %arg5[%c0_23, %c0_24] : memref<256x128xf32, #tpu.memory_space<vmem>>, vector<256x128xf32>
    tpu.vector_store %arg5[%c0_23, %c0_24], %110 {strides = array<i32>} : memref<256x128xf32, #tpu.memory_space<vmem>>, vector<256x128xf32>,
    return
  }
  func.func @transform_0(%arg0: i32) -> (i32, i32) {
    %c0_i32 = arith.constant 0 : i32
    %c0_i32_0 = arith.constant 0 : i32
    return %c0_i32, %arg0 : i32, i32
  }
  func.func @transform_1(%arg0: i32) -> (i32, i32) {
    %c0_i32 = arith.constant 0 : i32
    %c0_i32_0 = arith.constant 0 : i32
    return %c0_i32, %arg0 : i32, i32
  }
  func.func @transform_2(%arg0: i32) -> (i32, i32) {
    %c0_i32 = arith.constant 0 : i32
    %c0_i32_0 = arith.constant 0 : i32
    %c0_i32_1 = arith.constant 0 : i32
    return %c0_i32, %c0_i32_0 : i32, i32
  }
  func.func @transform_3(%arg0: i32) -> (i32, i32) {
    %c0_i32 = arith.constant 0 : i32
    %c0_i32_0 = arith.constant 0 : i32
    %c0_i32_1 = arith.constant 0 : i32
    return %c0_i32, %c0_i32_0 : i32, i32
  }
  func.func @transform_4(%arg0: i32) -> (i32, i32) {
    %c0_i32 = arith.constant 0 : i32
    %c0_i32_0 = arith.constant 0 : i32
    return %arg0, %c0_i32 : i32, i32
  }
}

</mosaic_0001>

<bundles_post_ra>
// kernel: tpu_custom_call.1
= control target key start
LH: loop header
LB: loop body
LE: loop exit
PB: predicated region body
PF: predicated region fallthrough
CT: control target
= control target key end

     0   :  { %9 = vsyncpa [#allocation4], 0  ;;  %s1453_s0 = inlined_call_operand.hbm [shape: f32[12,256], index: 0, kind: input, shape index: {}]   ;;  %s1454_s1 = inlined_call_operand.hbm [shape: f32[12,256], index: 1, kind: input, shape index: {}]   ;;  %s1455_s2 = inlined_call_operand.vmem [shape: f32[16,1], index: 2, kind: input, shape index: {}]   ;;  %s1456_s3 = inlined_call_operand.hbm [shape: f32[56,128], index: 3, kind: input, shape index: {}]   ;;  %s1457_s4 = inlined_call_operand.hbm [shape: f32[256,128], index: 4, kind: output, shape index: {}]  }
   0x1   :  { %10 = vsyncpa [#allocation7], 0 }
   0x2   :  { %11 = vsyncpa [#allocation5], 0  ;;  %s1187_s15 = smov [#allocation6]   ;;  %s1188_s17 = smov [#allocation3]  }
   0x3   :  { %s29_s16 = sshll.u32 %s1187_s15, 4  ;;  %s17_s18 = sshll.u32 %s1188_s17, 4  ;;  %s30_s16 = int_to_ptr.vmem [resolvable:$true] %s29_s16  ;;  %s18_s18 = int_to_ptr.vmem [resolvable:$true] %s17_s18 }
   0x4   :  { %s1109_s19 = scalar_lea.vmem %s30_s16, 512  ;;  %p1114_p1 = scmp.lt.s32.totalorder %s30_s16, %s30_s16 }
   0x5   :  { %p1110_p0 = scmp.ne.s32.totalorder %s30_s16, %s1109_s19  ;;  %p1115_p2 = scmp.lt.s32.totalorder %s1109_s19, %s1109_s19 }
   0x7   :  { %p1116_p3 = por %p1115_p2, %p1114_p1 }
   0x9   :  { %p1117_p4 = pnand %p1116_p3, %p1110_p0 }
   0xb   :  { %1120 = shalt.err (!%p1117_p4)
}
   0xc   :  { %s1189_s20 = smov 256   ;;  %s1190_s21 = smov 16  }
   0xd   :  { %35 = dma.hbm_to_vmem [thread:$0]  %s1454_s1, 512, %s30_s16, [#allocation7], %s1189_s20, %s1189_s20, %s1190_s21  }
   0xe   :  { %s1129_s24 = scalar_lea.vmem %s18_s18, 512  ;;  %p1134_p6 = scmp.lt.s32.totalorder %s18_s18, %s18_s18 }
   0xf   :  { %p1130_p5 = scmp.ne.s32.totalorder %s18_s18, %s1129_s24  ;;  %p1135_p7 = scmp.lt.s32.totalorder %s1129_s24, %s1129_s24 }
  0x11   :  { %p1136_p8 = por %p1135_p7, %p1134_p6 }
  0x13   :  { %p1137_p9 = pnand %p1136_p8, %p1130_p5 }
  0x15   :  { %1140 = shalt.err (!%p1137_p9)
}
  0x16   :  { %23 = dma.hbm_to_vmem [thread:$0]  %s1453_s0, 512, %s18_s18, [#allocation4], %s1189_s20, %s1189_s20, %s1190_s21  }
  0x17   :  { %s1191_s27 = smov [#allocation8]  }
  0x18   :  { %s43_s28 = sshll.u32 %s1191_s27, 4  ;;  %s44_s28 = int_to_ptr.vmem [resolvable:$true] %s43_s28 }
  0x19   :  { %s1149_s29 = scalar_lea.vmem %s44_s28, 896  ;;  %p1154_p11 = scmp.lt.s32.totalorder %s44_s28, %s44_s28 }
  0x1a   :  { %p1150_p10 = scmp.ne.s32.totalorder %s44_s28, %s1149_s29  ;;  %p1155_p12 = scmp.lt.s32.totalorder %s1149_s29, %s1149_s29 }
  0x1c   :  { %p1156_p13 = por %p1155_p12, %p1154_p11 }
  0x1e   :  { %p1157_p0 = pnand %p1156_p13, %p1150_p10 }
  0x20   :  { %1160 = shalt.err (!%p1157_p0)
}
  0x21   :  { %s1192_s1 = smov 128   ;;  %s1193_s30 = smov 8  }
  0x22   :  { %49 = dma.hbm_to_vmem [thread:$0]  %s1456_s3, 896, %s44_s28, [#allocation7], %s1192_s1, %s1192_s1, %s1193_s30  }
  0x23   :  { %1181 = dma.done.wait [#allocation4], 512  }
  0x24   :  { %1182 = vsyncadd [#allocation4], 4294966784 }
  0x25   :  { %1183 = dma.done.wait [#allocation7], 1408  }
  0x26   :  { %1184 = vsyncadd [#allocation7], 4294965888  ;;  %v1194_v0 = vmov 0   ;;  %v119_v1 = vlaneseq  ;;  %v117_v3 = vld [vmem:[%s1455_s2] sm:$0xff]  ;;  %v1239_v4 = vld [vmem:[#allocation3] sm:$0xff]  ;;  %v1195_v27 = vmov 0.0  }
  0x27   :  { %1084 = vset.pattern.permute.xlu0 %v1194_v0  ;;  %v1244_v6 = vld [vmem:[#allocation3 + $0x8] sm:$0xff]  ;;  %v1246_v7 = vld [vmem:[#allocation6] sm:$0xff]  ;;  %v118_v9 = vld [vmem:[%s1455_s2 + $0x8] sm:$0xff]  ;;  %71 = vst [vmem:[#allocation2 + $0x50] sm:$0xff] %v1195_v27  ;;  %vm187_vm0 = vcmask 1044480   ;;  %vm555_vm5 = vcmask 457728  }
  0x28   :  { %v1234_v2 = vshrl.u32 %v119_v1, 7  ;;  %129 = vperm.xlu0 %1084, %v117_v3   ;;  %v1248_v8 = vld [vmem:[#allocation6 + $0x8] sm:$0xff]  ;;  %v81_v10 = vsub.f32 %v1246_v7, %v1239_v4  ;;  %v1264_v21 = vld [vmem:[#allocation3 + $0x18] sm:$0xf]  ;;  %72 = vst [vmem:[#allocation2 + $0x68] sm:$0xff] %v1195_v27  ;;  %73 = vst [vmem:[#allocation2 + $0x8] sm:$0xff] %v1195_v27 }
  0x29   :  { %v82_v11 = vsub.f32 %v1248_v8, %v1244_v6  ;;  %74 = vst [vmem:[#allocation2 + $0x48] sm:$0xff] %v1195_v27  ;;  %75 = vst [vmem:[#allocation2 + $0x40] sm:$0xff] %v1195_v27  ;;  %v1272_v29 = vld [vmem:[#allocation3 + $0x10] sm:$0xf]  ;;  %v1292_v44 = vld [vmem:[#allocation6 + $0x18] sm:$0xf] }
  0x2a   :  { %v1242_v5 = vsub.s32 1, %v1234_v2  ;;  %v83_v12 = vmul.f32 %v81_v10, %v81_v10  ;;  %v1258_v14 = vsub.s32 0, %v1234_v2  ;;  %v1269_v24 = vsub.s32 2, %v1234_v2  ;;  %76 = vst [vmem:[#allocation2 + $0x20] sm:$0xff] %v1195_v27  ;;  %77 = vst [vmem:[#allocation2 + $0x10] sm:$0xff] %v1195_v27  ;;  %s1196_s2 = smov [#allocation9]  }
  0x2b   :  { %v84_v13 = vmul.f32 %v82_v11, %v82_v11  ;;  %78 = vst [vmem:[#allocation2 + $0x38] sm:$0xff] %v1195_v27  ;;  %79 = vst [vmem:[#allocation2 + $0x60] sm:$0xff] %v1195_v27  ;;  %v1302_v56 = vld [vmem:[#allocation6 + $0x10] sm:$0xf]  ;;  %s914_s9 = sshll.u32 %s1196_s2, 4  ;;  %s915_s9 = int_to_ptr.vmem [resolvable:$true] %s914_s9 }
  0x2c   :  { %134 = vperm.xlu0 %1084, %v118_v9   ;;  %v1261_v15 = vrot.slane %v81_v10, %v1242_v5  ;;  %v178_v16 = vrot.slane %v82_v11, %v1242_v5  ;;  %v87_v17 = vrot.slane %v83_v12, 1  ;;  %v93_v19 = vrot.slane %v83_v12, 2  ;;  %80 = vst [vmem:[#allocation2 + $0x28] sm:$0xff] %v1195_v27  ;;  %s1161_s10 = scalar_lea.vmem %s915_s9, 4096  ;;  %p1166_p2 = scmp.lt.s32.totalorder %s915_s9, %s915_s9 }
  0x2d   :  { %v88_v18 = vrot.slane %v84_v13, 1  ;;  %v94_v20 = vrot.slane %v84_v13, 2  ;;  %v168_v28 = vrot.slane %v82_v11, %v1258_v14  ;;  %v205_v32 = vrot.slane %v82_v11, %v1269_v24  ;;  %p1162_p1 = scmp.ne.s32.totalorder %s915_s9, %s1161_s10  ;;  %p1167_p3 = scmp.lt.s32.totalorder %s1161_s10, %s1161_s10 }
  0x2e   :  { %v180_v22 = vmul.f32 %v178_v16, %v1244_v6  ;;  %v182_v23 = vmul.f32 %v178_v16, %v1264_v21  ;;  %v91_v25 = vadd.f32 %v87_v17, %v83_v12  ;;  %v164_v33 = vrot.slane %v81_v10, %v1258_v14 }
  0x2f   :  { %v92_v26 = vadd.f32 %v88_v18, %v84_v13  ;;  %v170_v36 = vmul.f32 %v168_v28, %v1244_v6  ;;  %v207_v38 = vmul.f32 %v205_v32, %v1264_v21  ;;  %v179_v39 = vmul.f32 %v1261_v15, %v1239_v4  ;;  %p1168_p4 = por %p1167_p3, %p1166_p2 }
  0x30   :  { %v191_v30 = vrot.slane %v180_v22, 3  ;;  %v192_v31 = vrot.slane %v182_v23, 3  ;;  %v1276_v34 = vadd.f32 %v93_v19, %v91_v25  ;;  %v181_v40 = vmul.f32 %v1261_v15, %v1272_v29 }
  0x31   :  { %v1278_v35 = vadd.f32 %v94_v20, %v92_v26  ;;  %v169_v43 = vmul.f32 %v164_v33, %v1239_v4  ;;  %v211_v47 = vrot.slane %v207_v38, 6  ;;  %v188_v49 = vrot.slane %v179_v39, 3  ;;  %p1169_p5 = pnand %p1168_p4, %p1162_p1 }
  0x32   :  { %v193_v37 = vsel %vm187_vm0, %v191_v30, %v192_v31  ;;  %1085 = vrsqrt.f32 %v1276_v34  ;;  %v104_v41 = vand.u32 2147483648, %v1276_v34  ;;  %v113_v48 = vadd.f32 1.0, %v1276_v34 }
  0x33   :  { %1087 = vrsqrt.f32 %v1278_v35  ;;  %v111_v42 = vand.u32 2147483648, %v1278_v35  ;;  %v114_v45 = vadd.f32 1.0, %v1278_v35  ;;  %v197_v46 = vadd.f32 %v193_v37, %v170_v36 }
  0x34   :  { %v189_v50 = vrot.slane %v181_v40, 3  ;;  %v201_v51 = vrot.slane %v81_v10, %v1269_v24  ;;  %v227_v52 = vmul.f32 %v168_v28, %v1248_v8  ;;  %v229_v54 = vmul.f32 %v178_v16, %v1248_v8 }
  0x35   :  { %1089 = vrsqrt.f32 %v114_v45  ;;  %v1298_v53 = vadd.f32 %v211_v47, %v197_v46  ;;  %v231_v55 = vmul.f32 %v178_v16, %v1292_v44  ;;  %vm101_vm1 = vcmp.eq.f32.partialorder %v1276_v34, inf }
  0x36   :  { %1091 = vrsqrt.f32 %v113_v48  ;;  %v190_v57 = vsel %vm187_vm0, %v188_v49, %v189_v50  ;;  %v206_v58 = vmul.f32 %v201_v51, %v1272_v29  ;;  %v247_v59 = vmul.f32 %v205_v32, %v1292_v44 }
  0x37   :  { %vm103_vm2 = vcmp.eq.f32.partialorder %v1276_v34, 0.0  ;;  %vm108_vm3 = vcmp.eq.f32.partialorder %v1278_v35, inf  ;;  %v196_v60 = vadd.f32 %v190_v57, %v169_v43  ;;  %v239_v61 = vrot.slane %v229_v54, 3 }
  0x38   :  { %v240_v62 = vrot.slane %v231_v55, 3  ;;  %v226_v63 = vmul.f32 %v164_v33, %v1246_v7  ;;  %vm110_vm4 = vcmp.eq.f32.partialorder %v1278_v35, 0.0  ;;  %v210_v0 = vrot.slane %v206_v58, 6 }
  0x39   :  { %v251_v1 = vrot.slane %v247_v59, 6  ;;  %v228_v3 = vmul.f32 %v1261_v15, %v1246_v7  ;;  %v230_v9 = vmul.f32 %v1261_v15, %v1302_v56  ;;  %v246_v11 = vmul.f32 %v201_v51, %v1302_v56 }
  0x3a   :  { %v241_v10 = vsel %vm187_vm0, %v239_v61, %v240_v62  ;;  %v1319_v12 = vsub.s32 3, %v1234_v2  ;;  %v296_v13 = vsub.s32 6, %v1234_v2  ;;  %v214_v16 = vadd.f32 %v210_v0, %v196_v60 }
  0x3b   :  { %v245_v17 = vadd.f32 %v241_v10, %v227_v52  ;;  %v236_v18 = vrot.slane %v228_v3, 3  ;;  %v237_v19 = vrot.slane %v230_v9, 3  ;;  %v250_v20 = vrot.slane %v246_v11, 6 }
  0x3c   :  { %v291_v22 = vrot.slane %v1244_v6, %v1319_v12  ;;  %v301_v23 = vrot.slane %v1244_v6, %v296_v13  ;;  %v327_v15 = vrot.slane %v1264_v21, %v1242_v5  ;;  %v287_v27 = vrot.slane %v1239_v4, %v1319_v12 }
  0x3d   :  { %v255_v25 = vadd.f32 %v251_v1, %v245_v17  ;;  %v238_v26 = vsel %vm187_vm0, %v236_v18, %v237_v19  ;;  %v297_v28 = vrot.slane %v1239_v4, %v296_v13  ;;  %v323_v57 = vrot.slane %v1272_v29, %v1242_v5 }
  0x3e   :  { %v244_v30 = vadd.f32 %v238_v26, %v226_v63  ;;  %v293_v31 = vmul.f32 %v291_v22, %v1248_v8  ;;  %v303_v32 = vmul.f32 %v301_v23, %v1248_v8  ;;  %v305_v33 = vmul.f32 %v301_v23, %v1292_v44 }
  0x3f   :  { %v1086_v36 = vpop.eup %1085  ;;  %v329_v37 = vmul.f32 %v327_v15, %v1292_v44  ;;  %v292_v38 = vmul.f32 %v287_v27, %v1246_v7  ;;  %v302_v39 = vmul.f32 %v297_v28, %v1246_v7  ;;  %v304_v40 = vmul.f32 %v297_v28, %v1302_v56 }
  0x40   :  { %v1088_v43 = vpop.eup %1087  ;;  %v100_v45 = vmul.f32 %v1086_v36, %v1276_v34  ;;  %v254_v46 = vadd.f32 %v250_v20, %v244_v30  ;;  %v313_v47 = vrot.slane %v303_v32, 3  ;;  %v314_v48 = vrot.slane %v305_v33, 3 }
  0x41   :  { %v107_v49 = vmul.f32 %v1088_v43, %v1278_v35  ;;  %v333_v50 = vrot.slane %v329_v37, 6  ;;  %v310_v51 = vrot.slane %v302_v39, 3  ;;  %v311_v52 = vrot.slane %v304_v40, 3 }
  0x42   :  { %v102_v54 = vsel %vm101_vm1, %v1276_v34, %v100_v45  ;;  %v315_v55 = vsel %vm187_vm0, %v313_v47, %v314_v48  ;;  %v348_v58 = vsub.s32 4, %v1234_v2  ;;  %v1090_v59 = vpop.eup %1089  ;;  %v358_v27 = vsub.s32 7, %v1234_v2 }
  0x43   :  { %v105_v60 = vsel %vm103_vm2, %v104_v41, %v102_v54  ;;  %v109_v61 = vsel %vm108_vm3, %v1278_v35, %v107_v49  ;;  %v319_v62 = vadd.f32 %v315_v55, %v293_v31  ;;  %v312_v63 = vsel %vm187_vm0, %v310_v51, %v311_v52  ;;  %v1092_v0 = vpop.eup %1091 }
  0x44   :  { %v112_v5 = vsel %vm110_vm4, %v111_v42, %v109_v61  ;;  %v1360_v1 = vrot.slane %v105_v60, %v1258_v14  ;;  %v223_v3 = vrot.slane %v1090_v59, %v1258_v14  ;;  %v257_v34 = vsub.f32 0.0, %v1090_v59 }
  0x45   :  { %v1364_v41 = vrot.slane %v112_v5, %v1258_v14  ;;  %v219_v9 = vrot.slane %v1092_v0, %v1258_v14  ;;  %v256_v10 = vsub.f32 0.0, %v1092_v0  ;;  %v337_v11 = vadd.f32 %v333_v50, %v319_v62 }
  0x46   :  { %v225_v13 = vmul.f32 %v223_v3, %v1298_v53  ;;  %v265_v17 = vrot.slane %v257_v34, %v1258_v14  ;;  %v318_v18 = vadd.f32 %v312_v63, %v292_v38  ;;  %v328_v35 = vmul.f32 %v323_v57, %v1302_v56 }
  0x47   :  { %v224_v42 = vmul.f32 %v219_v9, %v214_v16  ;;  %v261_v19 = vrot.slane %v256_v10, %v1258_v14  ;;  %v341_v20 = vrot.slane %v337_v11, 3  ;;  %v353_v22 = vrot.slane %v1244_v6, %v348_v58  ;;  %v554_v11 = vld [vmem:[#allocation8 + $0x30] sm:$0xff] }
  0x48   :  { %v271_v23 = vrot.slane %v225_v13, 3  ;;  %v267_v15 = vmul.f32 %v265_v17, %v255_v25  ;;  %v332_v26 = vrot.slane %v328_v35, 6  ;;  %v389_v31 = vrot.slane %v1264_v21, %v1269_v24  ;;  %v553_v13 = vld [vmem:[#allocation8 + $0x28] sm:$0xff]  ;;  %998 = vmatprep.subr.mxu0 %v554_v11  ;;  %1060 = vmatprep.subr.mxu1 %v554_v11 }
  0x49   :  { %v270_v28 = vrot.slane %v224_v42, 3  ;;  %v266_v30 = vmul.f32 %v261_v19, %v254_v46  ;;  %345 = vst [vmem:[#allocation2 + $0x20] sm:$0x7] %v341_v20  ;;  %v355_v53 = vmul.f32 %v353_v22, %v1248_v8  ;;  %v363_v33 = vrot.slane %v1244_v6, %v358_v27  ;;  %999 = vmatpush3.msra.mxu0 %v554_v11 }
  0x4a   :  { %275 = vst [vmem:[#allocation2 + $0x68] sm:$0x7] %v271_v23  ;;  %v279_v16 = vrot.slane %v267_v15, 3  ;;  %v336_v32 = vadd.f32 %v332_v26, %v318_v18  ;;  %v349_v36 = vrot.slane %v1239_v4, %v348_v58  ;;  %v391_v37 = vmul.f32 %v389_v31, %v1292_v44  ;;  %1067 = vmatpush3.msra.mxu1 %v554_v11  ;;  %v551_v26 = vld [vmem:[#allocation8 + $0x18] sm:$0xff] }
  0x4b   :  { %274 = vst [vmem:[#allocation2 + $0x50] sm:$0x7] %v270_v28  ;;  %v278_v25 = vrot.slane %v266_v30, 3  ;;  %v359_v38 = vrot.slane %v1239_v4, %v358_v27  ;;  %v385_v39 = vrot.slane %v1272_v29, %v1269_v24  ;;  %v365_v43 = vmul.f32 %v363_v33, %v1248_v8  ;;  %1000 = vmatprep.subr.mxu0 %v553_v13  ;;  %v550_v30 = vld [vmem:[#allocation8 + $0x10] sm:$0xff] }
  0x4c   :  { %283 = vst [vmem:[#allocation2 + $0x48] sm:$0x7] %v279_v16  ;;  %v340_v40 = vrot.slane %v336_v32, 3  ;;  %v367_v45 = vmul.f32 %v363_v33, %v1292_v44  ;;  %v354_v46 = vmul.f32 %v349_v36, %v1246_v7  ;;  %v395_v47 = vrot.slane %v391_v37, 6  ;;  %1061 = vmatprep.subr.mxu1 %v553_v13  ;;  %1001 = vmatpush3.msra.mxu0 %v553_v13 }
  0x4d   :  { %282 = vst [vmem:[#allocation2 + $0x8] sm:$0x7] %v278_v25  ;;  %v364_v48 = vmul.f32 %v359_v38, %v1246_v7  ;;  %v366_v49 = vmul.f32 %v359_v38, %v1302_v56  ;;  %v390_v50 = vmul.f32 %v385_v39, %v1302_v56  ;;  %v375_v51 = vrot.slane %v365_v43, 3  ;;  %1068 = vmatpush3.msra.mxu1 %v553_v13 }
  0x4e   :  { %344 = vst [vmem:[#allocation2 + $0x40] sm:$0x7] %v340_v40  ;;  %v376_v52 = vrot.slane %v367_v45, 3  ;;  %v410_v24 = vsub.s32 5, %v1234_v2  ;;  %v425_v54 = vrot.slane %v1264_v21, %v1258_v14  ;;  %v451_v59 = vrot.slane %v1264_v21, %v1319_v12 }
  0x4f   :  { %v372_v55 = vrot.slane %v364_v48, 3  ;;  %v373_v57 = vrot.slane %v366_v49, 3  ;;  %v394_v58 = vrot.slane %v390_v50, 6  ;;  %v421_v18 = vrot.slane %v1272_v29, %v1258_v14 }
  0x50   :  { %v377_v60 = vsel %vm187_vm0, %v375_v51, %v376_v52  ;;  %v415_v61 = vrot.slane %v1244_v6, %v410_v24  ;;  %v427_v62 = vmul.f32 %v425_v54, %v1248_v8  ;;  %v429_v63 = vmul.f32 %v425_v54, %v1292_v44  ;;  %v549_v54 = vld [vmem:[#allocation8 + $0x8] sm:$0xff] }
  0x51   :  { %v381_v0 = vadd.f32 %v377_v60, %v355_v53  ;;  %v374_v2 = vsel %vm187_vm0, %v372_v55, %v373_v57  ;;  %v453_v5 = vmul.f32 %v451_v59, %v1292_v44  ;;  %v411_v3 = vrot.slane %v1239_v4, %v410_v24  ;;  %v548_v55 = vld [vmem:[#allocation8] sm:$0xff]  ;;  %v475_v60 = vld [vmem:[#allocation2 + $0x68] sm:$0xff] }
  0x52   :  { %v380_v34 = vadd.f32 %v374_v2, %v354_v46  ;;  %v417_v9 = vmul.f32 %v415_v61, %v1248_v8  ;;  %v437_v10 = vrot.slane %v427_v62, 3  ;;  %v438_v21 = vrot.slane %v429_v63, 3  ;;  %v552_v8 = vld [vmem:[#allocation8 + $0x20] sm:$0xff] }
  0x53   :  { %v399_v17 = vadd.f32 %v395_v47, %v381_v0  ;;  %v457_v6 = vrot.slane %v453_v5, 6  ;;  %v447_v4 = vrot.slane %v1272_v29, %v1319_v12  ;;  %v426_v20 = vmul.f32 %v421_v18, %v1246_v7  ;;  %1002 = vmatprep.subr.mxu0 %v552_v8  ;;  %1062 = vmatprep.subr.mxu1 %v552_v8  ;;  %v474_v59 = vld [vmem:[#allocation2 + $0x50] sm:$0xff]  ;;  %v477_v62 = vld [vmem:[#allocation2 + $0x48] sm:$0xff]  ;;  %v479_v0 = vld [vmem:[#allocation2 + $0x20] sm:$0xff] }
  0x54   :  { %v398_v35 = vadd.f32 %v394_v58, %v380_v34  ;;  %v439_v42 = vsel %vm187_vm0, %v437_v10, %v438_v21  ;;  %v428_v22 = vmul.f32 %v421_v18, %v1302_v56  ;;  %v416_v23 = vmul.f32 %v411_v3, %v1246_v7  ;;  %1003 = vmatpush3.msra.mxu0 %v552_v8  ;;  %v476_v61 = vld [vmem:[#allocation2 + $0x8] sm:$0xff] }
  0x55   :  { %v403_v44 = vrot.slane %v399_v17, 3  ;;  %v443_v19 = vadd.f32 %v439_v42, %v417_v9  ;;  %v452_v15 = vmul.f32 %v447_v4, %v1302_v56  ;;  %v434_v12 = vrot.slane %v426_v20, 3  ;;  %1069 = vmatpush3.msra.mxu1 %v552_v8  ;;  %1004 = vmatprep.subr.mxu0 %v551_v26  ;;  %v478_v63 = vld [vmem:[#allocation2 + $0x40] sm:$0xff] }
  0x56   :  { %v402_v14 = vrot.slane %v398_v35, 3  ;;  %v435_v27 = vrot.slane %v428_v22, 3  ;;  %1063 = vmatprep.subr.mxu1 %v551_v26  ;;  %1005 = vmatpush3.msra.mxu0 %v551_v26 }
  0x57   :  { %407 = vst [vmem:[#allocation2 + $0x38] sm:$0x7] %v403_v44  ;;  %v461_v29 = vadd.f32 %v457_v6, %v443_v19  ;;  %v456_v28 = vrot.slane %v452_v15, 6  ;;  %1070 = vmatpush3.msra.mxu1 %v551_v26  ;;  %1006 = vmatprep.subr.mxu0 %v550_v30 }
  0x58   :  { %406 = vst [vmem:[#allocation2 + $0x10] sm:$0x7] %v402_v14  ;;  %v436_v31 = vsel %vm187_vm0, %v434_v12, %v435_v27  ;;  %1064 = vmatprep.subr.mxu1 %v550_v30  ;;  %1007 = vmatpush3.msra.mxu0 %v550_v30 }
  0x59   :  { %v465_v53 = vrot.slane %v461_v29, 3  ;;  %v442_v7 = vadd.f32 %v436_v31, %v416_v23  ;;  %1071 = vmatpush3.msra.mxu1 %v550_v30  ;;  %1008 = vmatprep.subr.mxu0 %v549_v54 }
  0x5a   :  { %1065 = vmatprep.subr.mxu1 %v549_v54  ;;  %1009 = vmatpush3.msra.mxu0 %v549_v54 }
  0x5b   :  { %469 = vst [vmem:[#allocation2 + $0x28] sm:$0x7] %v465_v53  ;;  %v460_v56 = vadd.f32 %v456_v28, %v442_v7  ;;  %1072 = vmatpush3.msra.mxu1 %v549_v54  ;;  %1010 = vmatprep.subr.mxu0 %v548_v55 }
  0x5c   :  { %1066 = vmatprep.subr.mxu1 %v548_v55  ;;  %1011 = vmatpush3.msra.mxu0 %v548_v55 }
  0x5d   :  { %v464_v16 = vrot.slane %v460_v56, 3  ;;  %1073 = vmatpush3.msra.mxu1 %v548_v55 }
  0x5e   :  { %v481_v5 = vld [vmem:[#allocation2 + $0x38] sm:$0xff] }
  0x5f   :  { %468 = vst [vmem:[#allocation2 + $0x60] sm:$0x7] %v464_v16  ;;  %v480_v2 = vld [vmem:[#allocation2 + $0x10] sm:$0xff] }
  0x62   :  { %v483_v34 = vld [vmem:[#allocation2 + $0x28] sm:$0xff] }
  0x66   :  { %v482_v3 = vld [vmem:[#allocation2 + $0x60] sm:$0xff] }
  0xa3   :  { %v130_v32 = vpop.permute.xlu0 %129 }
  0xa4   :  { %v137_v33 = vsub.f32 %v1360_v1, %v130_v32  ;;  %v138_v36 = vsub.f32 %v1364_v41, %v130_v32 }
  0xa6   :  { %v141_v25 = vmul.f32 %v137_v33, %v137_v33  ;;  %v142_v37 = vmul.f32 %v138_v36, %v138_v36 }
  0xa7   :  { %v135_v38 = vpop.permute.xlu0 %134 }
  0xa8   :  { %v145_v39 = vsub.f32 0.0, %v141_v25  ;;  %v146_v40 = vsub.f32 0.0, %v142_v37  ;;  %v139_v43 = vsub.f32 %v1360_v1, %v135_v38  ;;  %v140_v45 = vsub.f32 %v1364_v41, %v135_v38 }
  0xaa   :  { %v149_v46 = vmul.f32 1.442695, %v145_v39  ;;  %v151_v47 = vmul.f32 1.442695, %v146_v40  ;;  %v143_v48 = vmul.f32 %v139_v43, %v139_v43  ;;  %v144_v49 = vmul.f32 %v140_v45, %v140_v45 }
  0xac   :  { %1093 = vpow2.f32 %v149_v46  ;;  %v147_v50 = vsub.f32 0.0, %v143_v48  ;;  %v148_v51 = vsub.f32 0.0, %v144_v49 }
  0xad   :  { %1095 = vpow2.f32 %v151_v47 }
  0xae   :  { %v153_v52 = vmul.f32 1.442695, %v147_v50  ;;  %v155_v24 = vmul.f32 1.442695, %v148_v51 }
  0xb0   :  { %1097 = vpow2.f32 %v153_v52 }
  0xb1   :  { %1099 = vpow2.f32 %v155_v24 }
  0xb9   :  { %v1094_v57 = vpop.eup %1093 }
  0xba   :  { %v1096_v1 = vpop.eup %1095  ;;  %484 = vxpose.xlu1.b32.start [1/7] (short) %v1094_v57, 128 }
  0xbb   :  { %516 = vxpose.xlu0.b32.start [1/7] (short) %v1096_v1, 128 }
  0xbd   :  { %v1098_v41 = vpop.eup %1097 }
  0xbe   :  { %v1100_v58 = vpop.eup %1099  ;;  %485 = vxpose.xlu1.b32.cont [2/7] (short) %v1098_v41, 128 }
  0xbf   :  { %517 = vxpose.xlu0.b32.cont [2/7] (short) %v1100_v58, 128 }
  0xc2   :  { %486 = vxpose.xlu1.b32.cont [3/7] (short) %v474_v59, 128 }
  0xc3   :  { %518 = vxpose.xlu0.b32.cont [3/7] (short) %v475_v60, 128 }
  0xc6   :  { %487 = vxpose.xlu1.b32.cont [4/7] (short) %v476_v61, 128 }
  0xc7   :  { %519 = vxpose.xlu0.b32.cont [4/7] (short) %v477_v62, 128 }
  0xca   :  { %488 = vxpose.xlu1.b32.cont [5/7] (short) %v478_v63, 128 }
  0xcb   :  { %520 = vxpose.xlu0.b32.cont [5/7] (short) %v479_v0, 128 }
  0xce   :  { %489 = vxpose.xlu1.b32.cont [6/7] (short) %v480_v2, 128 }
  0xcf   :  { %521 = vxpose.xlu0.b32.cont [6/7] (short) %v481_v5, 128 }
  0xd2   :  { %490 = vxpose.xlu1.b32.end [7/7] (short) %v482_v3, 128 }
  0xd3   :  { %522 = vxpose.xlu0.b32.end [7/7] (short) %v483_v34, 128 }
 0x136   :  { %v500_v9 = vpop.trf.xlu1 }
 0x137   :  { %v532_v10 = vpop.trf.xlu0  ;;  %1012 = vmatprep.mubr.msk.f32.mxu0 %vm555_vm5, %v500_v9 }
 0x138   :  { %1036 = vmatprep.mubr.msk.f32.mxu1 %vm555_vm5, %v532_v10 }
 0x13a   :  { %v501_v21 = vpop.trf.xlu1 }
 0x13b   :  { %v533_v11 = vpop.trf.xlu0  ;;  %1013 = vmatmul.mubr.msk.f32.vlgmr.msra.gmra.mxu0 %vm555_vm5, %v501_v21 }
 0x13c   :  { %1037 = vmatmul.mubr.msk.f32.vlgmr.msra.gmra.mxu1 %vm555_vm5, %v533_v11 }
 0x13e   :  { %v502_v13 = vpop.trf.xlu1 }
 0x13f   :  { %v534_v17 = vpop.trf.xlu0  ;;  %1015 = vmatprep.mubr.msk.f32.mxu0 %vm555_vm5, %v502_v13 }
 0x140   :  { %1039 = vmatprep.mubr.msk.f32.mxu1 %vm555_vm5, %v534_v17 }
 0x142   :  { %v503_v6 = vpop.trf.xlu1 }
 0x143   :  { %v535_v18 = vpop.trf.xlu0  ;;  %1016 = vmatmul.mubr.msk.f32.gmra.mxu0 %vm555_vm5, %v503_v6 }
 0x144   :  { %1040 = vmatmul.mubr.msk.f32.gmra.mxu1 %vm555_vm5, %v535_v18 }
 0x146   :  { %v504_v35 = vpop.trf.xlu1 }
 0x147   :  { %v536_v42 = vpop.trf.xlu0  ;;  %1018 = vmatprep.mubr.msk.f32.mxu0 %vm555_vm5, %v504_v35 }
 0x148   :  { %1042 = vmatprep.mubr.msk.f32.mxu1 %vm555_vm5, %v536_v42 }
 0x14a   :  { %v505_v4 = vpop.trf.xlu1 }
 0x14b   :  { %v537_v8 = vpop.trf.xlu0  ;;  %1019 = vmatmul.mubr.msk.f32.gmra.mxu0 %vm555_vm5, %v505_v4 }
 0x14c   :  { %1043 = vmatmul.mubr.msk.f32.gmra.mxu1 %vm555_vm5, %v537_v8 }
 0x14e   :  { %v506_v44 = vpop.trf.xlu1 }
 0x14f   :  { %v538_v19 = vpop.trf.xlu0  ;;  %1021 = vmatprep.mubr.msk.f32.mxu0 %vm555_vm5, %v506_v44 }
 0x150   :  { %1045 = vmatprep.mubr.msk.f32.mxu1 %vm555_vm5, %v538_v19 }
 0x152   :  { %v507_v20 = vpop.trf.xlu1 }
 0x153   :  { %v539_v22 = vpop.trf.xlu0  ;;  %1022 = vmatmul.mubr.msk.f32.gmra.mxu0 %vm555_vm5, %v507_v20 }
 0x154   :  { %1046 = vmatmul.mubr.msk.f32.gmra.mxu1 %vm555_vm5, %v539_v22 }
 0x156   :  { %v508_v14 = vpop.trf.xlu1 }
 0x157   :  { %v540_v23 = vpop.trf.xlu0  ;;  %1024 = vmatprep.mubr.msk.f32.mxu0 %vm555_vm5, %v508_v14 }
 0x158   :  { %1048 = vmatprep.mubr.msk.f32.mxu1 %vm555_vm5, %v540_v23 }
 0x15a   :  { %v509_v15 = vpop.trf.xlu1 }
 0x15b   :  { %v541_v26 = vpop.trf.xlu0  ;;  %1025 = vmatmul.mubr.msk.f32.gmra.mxu0 %vm555_vm5, %v509_v15 }
 0x15c   :  { %1049 = vmatmul.mubr.msk.f32.gmra.mxu1 %vm555_vm5, %v541_v26 }
 0x15e   :  { %v510_v29 = vpop.trf.xlu1 }
 0x15f   :  { %v542_v12 = vpop.trf.xlu0  ;;  %1027 = vmatprep.mubr.msk.f32.mxu0 %vm555_vm5, %v510_v29 }
 0x160   :  { %1051 = vmatprep.mubr.msk.f32.mxu1 %vm555_vm5, %v542_v12 }
 0x162   :  { %v511_v27 = vpop.trf.xlu1 }
 0x163   :  { %v543_v28 = vpop.trf.xlu0  ;;  %1028 = vmatmul.mubr.msk.f32.gmra.mxu0 %vm555_vm5, %v511_v27 }
 0x164   :  { %1052 = vmatmul.mubr.msk.f32.gmra.mxu1 %vm555_vm5, %v543_v28 }
 0x166   :  { %v512_v30 = vpop.trf.xlu1 }
 0x167   :  { %v544_v53 = vpop.trf.xlu0  ;;  %1030 = vmatprep.mubr.msk.f32.mxu0 %vm555_vm5, %v512_v30 }
 0x168   :  { %1054 = vmatprep.mubr.msk.f32.mxu1 %vm555_vm5, %v544_v53 }
 0x16a   :  { %v513_v31 = vpop.trf.xlu1 }
 0x16b   :  { %v545_v7 = vpop.trf.xlu0  ;;  %1031 = vmatmul.mubr.msk.f32.gmra.mxu0 %vm555_vm5, %v513_v31 }
 0x16c   :  { %1055 = vmatmul.mubr.msk.f32.gmra.mxu1 %vm555_vm5, %v545_v7 }
 0x16e   :  { %v514_v56 = vpop.trf.xlu1 }
 0x16f   :  { %v546_v16 = vpop.trf.xlu0  ;;  %1033 = vmatprep.mubr.msk.f32.mxu0 %vm555_vm5, %v514_v56 }
 0x170   :  { %1057 = vmatprep.mubr.msk.f32.mxu1 %vm555_vm5, %v546_v16 }
 0x172   :  { %v515_v32 = vpop.trf.xlu1 }
 0x173   :  { %v547_v33 = vpop.trf.xlu0  ;;  %1034 = vmatmul.mubr.msk.f32.gmra.mxu0 %vm555_vm5, %v515_v32 }
 0x174   :  { %1058 = vmatmul.mubr.msk.f32.gmra.mxu1 %vm555_vm5, %v547_v33 }
 0x1fb   :  { %v1014_v36 = vpop.f32.mrf.mxu0 }
 0x1fc   :  { %878 = vst [vmem:[#allocation9 + $0x8] sm:$0xff] %v1014_v36  ;;  %v1038_v25 = vpop.f32.mrf.mxu1 }
 0x1fd   :  { %894 = vst [vmem:[#allocation9 + $0x88] sm:$0xff] %v1038_v25  ;;  %v718_v37 = vpop.f32.mrf.mxu0 }
 0x1fe   :  { %877 = vst [vmem:[#allocation9] sm:$0xff] %v718_v37  ;;  %v798_v38 = vpop.f32.mrf.mxu1 }
 0x1ff   :  { %893 = vst [vmem:[#allocation9 + $0x80] sm:$0xff] %v798_v38 }
 0x203   :  { %v1017_v39 = vpop.f32.mrf.mxu0 }
 0x204   :  { %880 = vst [vmem:[#allocation9 + $0x18] sm:$0xff] %v1017_v39  ;;  %v1041_v40 = vpop.f32.mrf.mxu1 }
 0x205   :  { %896 = vst [vmem:[#allocation9 + $0x98] sm:$0xff] %v1041_v40  ;;  %v728_v43 = vpop.f32.mrf.mxu0 }
 0x206   :  { %879 = vst [vmem:[#allocation9 + $0x10] sm:$0xff] %v728_v43  ;;  %v808_v45 = vpop.f32.mrf.mxu1 }
 0x207   :  { %895 = vst [vmem:[#allocation9 + $0x90] sm:$0xff] %v808_v45 }
 0x20b   :  { %v1020_v46 = vpop.f32.mrf.mxu0 }
 0x20c   :  { %882 = vst [vmem:[#allocation9 + $0x28] sm:$0xff] %v1020_v46  ;;  %v1044_v47 = vpop.f32.mrf.mxu1 }
 0x20d   :  { %898 = vst [vmem:[#allocation9 + $0xa8] sm:$0xff] %v1044_v47  ;;  %v738_v48 = vpop.f32.mrf.mxu0 }
 0x20e   :  { %881 = vst [vmem:[#allocation9 + $0x20] sm:$0xff] %v738_v48  ;;  %v818_v49 = vpop.f32.mrf.mxu1 }
 0x20f   :  { %897 = vst [vmem:[#allocation9 + $0xa0] sm:$0xff] %v818_v49 }
 0x213   :  { %v1023_v50 = vpop.f32.mrf.mxu0 }
 0x214   :  { %884 = vst [vmem:[#allocation9 + $0x38] sm:$0xff] %v1023_v50  ;;  %v1047_v51 = vpop.f32.mrf.mxu1 }
 0x215   :  { %900 = vst [vmem:[#allocation9 + $0xb8] sm:$0xff] %v1047_v51  ;;  %v748_v52 = vpop.f32.mrf.mxu0 }
 0x216   :  { %883 = vst [vmem:[#allocation9 + $0x30] sm:$0xff] %v748_v52  ;;  %v828_v24 = vpop.f32.mrf.mxu1 }
 0x217   :  { %899 = vst [vmem:[#allocation9 + $0xb0] sm:$0xff] %v828_v24 }
 0x21b   :  { %v1026_v54 = vpop.f32.mrf.mxu0 }
 0x21c   :  { %886 = vst [vmem:[#allocation9 + $0x48] sm:$0xff] %v1026_v54  ;;  %v1050_v55 = vpop.f32.mrf.mxu1 }
 0x21d   :  { %902 = vst [vmem:[#allocation9 + $0xc8] sm:$0xff] %v1050_v55  ;;  %v758_v57 = vpop.f32.mrf.mxu0 }
 0x21e   :  { %885 = vst [vmem:[#allocation9 + $0x40] sm:$0xff] %v758_v57  ;;  %v838_v1 = vpop.f32.mrf.mxu1 }
 0x21f   :  { %901 = vst [vmem:[#allocation9 + $0xc0] sm:$0xff] %v838_v1 }
 0x223   :  { %v1029_v41 = vpop.f32.mrf.mxu0 }
 0x224   :  { %888 = vst [vmem:[#allocation9 + $0x58] sm:$0xff] %v1029_v41  ;;  %v1053_v58 = vpop.f32.mrf.mxu1 }
 0x225   :  { %904 = vst [vmem:[#allocation9 + $0xd8] sm:$0xff] %v1053_v58  ;;  %v768_v59 = vpop.f32.mrf.mxu0 }
 0x226   :  { %887 = vst [vmem:[#allocation9 + $0x50] sm:$0xff] %v768_v59  ;;  %v848_v60 = vpop.f32.mrf.mxu1 }
 0x227   :  { %903 = vst [vmem:[#allocation9 + $0xd0] sm:$0xff] %v848_v60 }
 0x22b   :  { %v1032_v61 = vpop.f32.mrf.mxu0 }
 0x22c   :  { %890 = vst [vmem:[#allocation9 + $0x68] sm:$0xff] %v1032_v61  ;;  %v1056_v62 = vpop.f32.mrf.mxu1 }
 0x22d   :  { %906 = vst [vmem:[#allocation9 + $0xe8] sm:$0xff] %v1056_v62  ;;  %v778_v63 = vpop.f32.mrf.mxu0 }
 0x22e   :  { %889 = vst [vmem:[#allocation9 + $0x60] sm:$0xff] %v778_v63  ;;  %v858_v0 = vpop.f32.mrf.mxu1 }
 0x22f   :  { %905 = vst [vmem:[#allocation9 + $0xe0] sm:$0xff] %v858_v0 }
 0x233   :  { %v1035_v2 = vpop.f32.mrf.mxu0 }
 0x234   :  { %892 = vst [vmem:[#allocation9 + $0x78] sm:$0xff] %v1035_v2  ;;  %v1059_v5 = vpop.f32.mrf.mxu1 }
 0x235   :  { %908 = vst [vmem:[#allocation9 + $0xf8] sm:$0xff] %v1059_v5  ;;  %v788_v3 = vpop.f32.mrf.mxu0 }
 0x236   :  { %891 = vst [vmem:[#allocation9 + $0x70] sm:$0xff] %v788_v3  ;;  %v868_v34 = vpop.f32.mrf.mxu1 }
 0x237   :  { %907 = vst [vmem:[#allocation9 + $0xf0] sm:$0xff] %v868_v34 }
 0x238   :  { %1172 = shalt.err (!%p1169_p5)
}
 0x239   :  { %920 = dma.vmem_to_hbm [thread:$0]  %s915_s9, 4096, %s1457_s4, [#allocation5], %s1192_s1, %s1192_s1, %s1193_s30  }
 0x23a   :  { %1185 = dma.done.wait [#allocation5], 4096  }
 0x23b   :  { %1186 = vsyncadd [#allocation5], 4294963200 }
 0x23c   :  { %924 = vsyncpa [#allocation4], 1 }
 0x23d   :  { %925 = vsyncpa [#allocation7], 1 }
 0x23e   :  { %926 = vsyncpa [#allocation5], 1 }

</bundles_post_ra>
